<compile_context>
chip_gen: v7x
topology: tpu7x:2x2x1
jax: 0.10.0
libtpu: 0.0.40
codegen_flags: <defaults>
</compile_context>

<pallas_src>
import jax
import jax.numpy as jnp
import numpy as np
from jax import lax
from jax.experimental import pallas as pl
from jax.experimental.pallas import tpu as pltpu


def _round_up(x: int, m: int) -> int:
    return (x + m - 1) // m * m


def _make_denom_kernel(pad_cols: float, precision):
    """Tile body: denom_i += sum_{j in tile, label_j != label_i} exp(cos_ij / T)."""

    def kernel(xr_ref, xct_ref, lrow_ref, lcol_ref, denom_ref, denom_acc):
        j = pl.program_id(1)

        @pl.when(j == 0)
        def _():
            denom_acc[...] = jnp.zeros_like(denom_acc)

        # MXU tile: rows were L2-normalized and prescaled by 1/sqrt(T) in the
        # wrapper and the column operand is pre-transposed, so this plain
        # (M,K)@(K,N) contraction is already cos_sim / T.
        sim = jnp.dot(xr_ref[...], xct_ref[...],
                      preferred_element_type=jnp.float32,
                      precision=precision)                       # (B, B) f32

        # Different-label mask.  Diagonal entries are same-label (excluded for
        # free); pad rows/cols carry a -1 sentinel that never matches a real
        # dense id in [0, n).
        diff = lrow_ref[...] != lcol_ref[...]                    # (B, B) bool

        # |cos/T| <= 1/T, so exp is safe without max-subtraction.
        e = jnp.exp(sim)
        denom_acc[...] += jnp.sum(jnp.where(diff, e, 0.0),
                                  axis=1, keepdims=True)

        @pl.when(j == pl.num_programs(1) - 1)
        def _():
            # Each zero-feature pad column added exactly exp(0)=1 to every
            # row's different-label sum; remove the constant here.
            denom_ref[...] = denom_acc[...] - pad_cols

    return kernel


def contrastive_loss_pallas(enc_features, labels, temperature: float = 0.5, *,
                            block_size: int = 512,
                            mxu_dtype=jnp.bfloat16) -> jax.Array:
    """enc_features: (N, D) float; labels: (N,) ints (or a Python list). Scalar f32."""
    if isinstance(labels, (list, tuple)):
        # host-side mapping of arbitrary hashable labels to ids (as in the module)
        lut = {lab: k for k, lab in enumerate(dict.fromkeys(labels))}
        labels = jnp.array([lut[lab] for lab in labels], dtype=jnp.int32)
    labels = jnp.asarray(labels).astype(jnp.int32)

    x = jnp.asarray(enc_features)
    n, d = x.shape

    # ---- O(N*D) prep: L2-normalize, fold 1/sqrt(T), dense label ids ----
    x32 = x.astype(jnp.float32)
    sq = jnp.sum(x32 * x32, axis=-1, keepdims=True)
    # TODO(synk): all-zero rows are clamped here (sim -> 0); the torch
    # reference divides by max(||xi||*||xj||, 1e-8) instead (edge-case diff).
    xs = x32 * lax.rsqrt(jnp.maximum(sq, 1e-12)) * np.float32(1.0 / np.sqrt(temperature))

    # dense label ids in [0, n): equal labels -> equal id, different -> different
    ids = jnp.searchsorted(jnp.sort(labels), labels).astype(jnp.int32)

    # per-row same-label statistics (removed from the kernel per perf review)
    counts = jax.ops.segment_sum(jnp.ones((n,), jnp.float32), ids, num_segments=n)
    cnt = counts[ids] - 1.0                                   # (n,)
    S = jax.ops.segment_sum(xs, ids, num_segments=n)          # (n, D) per-label sums
    ssum = jnp.sum(xs * S[ids], axis=1) - jnp.sum(xs * xs, axis=1)   # sum same-label cos/T

    # ---- tiling ----
    block_size = max(128, _round_up(block_size, 128))
    Nr = _round_up(max(n, 1), 128)
    B = min(block_size, Nr)
    if Nr > 128 and Nr // B < 2:            # >= 2 row blocks so v7x megacore is used
        B = max(128, _round_up((Nr + 1) // 2, 128))
    Np = _round_up(n, B)
    Dp = max(128, _round_up(d, 128))
    G = Np // B

    x_p = jnp.zeros((Np, Dp), dtype=mxu_dtype).at[:n, :d].set(xs.astype(mxu_dtype))
    x_t = x_p.T                                               # one-time (Dp, Np) transpose
    ids_p = jnp.full((Np,), -1, dtype=jnp.int32).at[:n].set(ids)
    lrow = ids_p.reshape(Np, 1)
    lcol = ids_p.reshape(1, Np)

    # rough VMEM budget: double-buffered row/col blocks + ~6 (B,B) f32 temps
    itemsize = jnp.dtype(mxu_dtype).itemsize
    est = 4 * B * Dp * itemsize + 6 * B * B * 4 + (1 << 20)
    vmem_limit = int(min(max(est, 32 << 20), 48 << 20))       # stay under v7x's 64 MiB

    precision = (lax.Precision.HIGHEST
                 if jnp.dtype(mxu_dtype) == jnp.float32 else lax.Precision.DEFAULT)

    denom_rows = pl.pallas_call(
        _make_denom_kernel(float(Np - n), precision),
        out_shape=jax.ShapeDtypeStruct((Np, 1), jnp.float32),
        grid_spec=pltpu.PrefetchScalarGridSpec(
            num_scalar_prefetch=0,
            grid=(G, G),
            in_specs=[
                pl.BlockSpec((B, Dp), lambda i, j: (i, 0)),   # row block (resident over j)
                pl.BlockSpec((Dp, B), lambda i, j: (0, j)),   # col block, pre-transposed
                pl.BlockSpec((B, 1), lambda i, j: (i, 0)),    # row label ids
                pl.BlockSpec((1, B), lambda i, j: (0, j)),    # col label ids
            ],
            out_specs=pl.BlockSpec((B, 1), lambda i, j: (i, 0)),
            scratch_shapes=[pltpu.VMEM((B, 1), jnp.float32)],
        ),
        compiler_params=pltpu.CompilerParams(
            dimension_semantics=("parallel", "arbitrary"),
            vmem_limit_bytes=vmem_limit),
    )(x_p, x_t, lrow, lcol)

    # ---- tiny O(N) final combine in plain JAX ----
    denom = denom_rows[:n, 0]
    # loss = sum_i [ cnt_i*log(denom_i) - sum_{j same,offdiag} cos_ij/T ] / (nnz + 1e-5)
    num = jnp.where(cnt > 0.0, cnt * jnp.log(denom), 0.0) - ssum
    nnz = jnp.sum(cnt)
    loss = jnp.sum(num) / (nnz + 1e-5)
    # early return of the reference: total over no_sim_sum == 0  <=>  no
    # different-label pair exists  <=>  all labels identical (or n < 2)
    has_diff = jnp.any(ids != ids[0])
    return jnp.where(has_diff, loss, jnp.float32(0.0))


def contrastive_loss_ref(enc_features, labels, temperature=0.5):
    """Plain-JAX reference mirroring the PyTorch module semantics."""
    x = enc_features.astype(jnp.float32)
    n = x.shape[0]
    norm = jnp.sqrt(jnp.sum(x * x, axis=1, keepdims=True))
    denom = jnp.maximum(norm @ norm.T, 1e-8)
    sim_mat = (x @ x.T) / denom
    mask = (labels[:, None] == labels[None, :]).astype(jnp.float32)
    eye = jnp.eye(n, dtype=jnp.float32)
    mask_no_sim = 1.0 - mask
    e = jnp.exp(sim_mat / temperature) * (1.0 - eye)
    sim = mask * e
    no_sim = e - sim
    no_sim_sum = jnp.sum(no_sim, axis=1, keepdims=True)
    total = jnp.sum(no_sim_sum)
    loss_mat = -jnp.log(mask_no_sim + sim / no_sim_sum + eye)
    nnz = jnp.sum((loss_mat != 0.0).astype(jnp.float32))
    loss = jnp.sum(loss_mat) / (nnz + 1e-5)
    return jnp.where(total == 0.0, jnp.float32(0.0), loss)


if __name__ == "__main__":
    key = jax.random.PRNGKey(0)

    # --- small test matching the module's (n, d) encoder-feature input ---
    n, d = 8, 32
    kx, krest = jax.random.split(key)
    enc_features = jax.random.normal(kx, (n, d), dtype=jnp.float32)
    labels = jnp.array([0, 1, 0, 1, 2, 2, 0, 1], dtype=jnp.int32)

    ref = jax.block_until_ready(contrastive_loss_ref(enc_features, labels, 0.5))

    # f32 MXU path: tight check against the reference semantics
    out_f32 = jax.block_until_ready(
        contrastive_loss_pallas(enc_features, labels, 0.5, mxu_dtype=jnp.float32))
    np.testing.assert_allclose(np.asarray(out_f32), np.asarray(ref),
                               rtol=1e-4, atol=1e-5)

    # bf16 MXU path (default)
    out_bf16 = jax.block_until_ready(
        contrastive_loss_pallas(enc_features, labels, 0.5))
    np.testing.assert_allclose(np.asarray(out_bf16), np.asarray(ref),
                               rtol=5e-2, atol=5e-2)

    # --- multi-block grid + N/D padding path (tiled reduction, pad columns) ---
    n2, d2 = 300, 48
    kx2, kl2 = jax.random.split(krest)
    feats2 = jax.random.normal(kx2, (n2, d2), dtype=jnp.float32)
    labels2 = jax.random.randint(kl2, (n2,), 0, 7, dtype=jnp.int32)
    ref2 = jax.block_until_ready(contrastive_loss_ref(feats2, labels2, 0.5))

    out2 = jax.block_until_ready(
        contrastive_loss_pallas(feats2, labels2, 0.5, block_size=128,
                                mxu_dtype=jnp.float32))
    np.testing.assert_allclose(np.asarray(out2), np.asarray(ref2),
                               rtol=1e-4, atol=1e-4)

    # default block sizing (halved so >= 2 row blocks for megacore), bf16 path
    out3 = jax.block_until_ready(contrastive_loss_pallas(feats2, labels2, 0.5))
    np.testing.assert_allclose(np.asarray(out3), np.asarray(ref2),
                               rtol=5e-2, atol=5e-2)

    # degenerate case: all labels identical -> early return 0
    out4 = jax.block_until_ready(
        contrastive_loss_pallas(enc_features, jnp.zeros((n,), jnp.int32), 0.5))
    np.testing.assert_allclose(np.asarray(out4), 0.0)

    print("KERNEL_OK")
</pallas_src>

<mosaic_0001>
module attributes {stable_mosaic.version = 11 : i64} {
  func.func @kernel(%arg0: i32, %arg1: i32, %arg2: memref<128x128xf32, #tpu.memory_space<vmem>>, %arg3: memref<128x128xf32, #tpu.memory_space<vmem>>, %arg4: memref<128x1xi32, #tpu.memory_space<vmem>>, %arg5: memref<1x128xi32, #tpu.memory_space<vmem>>, %arg6: memref<128x1xf32, #tpu.memory_space<vmem>>, %arg7: memref<128x1xf32, #tpu.memory_space<vmem>>) attributes {dimension_semantics = [#tpu.dimension_semantics<parallel>, #tpu.dimension_semantics<arbitrary>], iteration_bounds = array<i64: 1, 1>, scalar_prefetch = 0 : i64, scratch_operands = 1 : i64, tpu.core_type = #tpu.core_type<tc>, window_params = [{transform_indices = @transform_0, window_bounds = array<i64: 128, 128>}, {transform_indices = @transform_1, window_bounds = array<i64: 128, 128>}, {transform_indices = @transform_2, window_bounds = array<i64: 128, 1>}, {transform_indices = @transform_3, window_bounds = array<i64: 1, 128>}, {transform_indices = @transform_4, window_bounds = array<i64: 128, 1>}]} {
    %c0_i32 = arith.constant 0 : i32
    %0 = arith.cmpi eq, %arg1, %c0_i32 : i32
    %1 = arith.extui %0 : i1 to i32
    %c0_i32_0 = arith.constant 0 : i32
    %2 = arith.cmpi ne, %1, %c0_i32_0 : i32
    scf.if %2 {
      %cst_16 = arith.constant 0.000000e+00 : f32
      %22 = vector.broadcast %cst_16 : f32 to vector<128x1xf32>
      %c0_17 = arith.constant 0 : index
      %c0_18 = arith.constant 0 : index
      %23 = vector.load %arg7[%c0_17, %c0_18] : memref<128x1xf32, #tpu.memory_space<vmem>>, vector<128x1xf32>
      tpu.vector_store %arg7[%c0_17, %c0_18], %22 {strides = array<i32>} : memref<128x1xf32, #tpu.memory_space<vmem>>, vector<128x1xf32>,
    } else {
    }
    %c0 = arith.constant 0 : index
    %c0_1 = arith.constant 0 : index
    %3 = vector.load %arg2[%c0, %c0_1] : memref<128x128xf32, #tpu.memory_space<vmem>>, vector<128x128xf32>
    %c0_2 = arith.constant 0 : index
    %c0_3 = arith.constant 0 : index
    %4 = vector.load %arg3[%c0_2, %c0_3] : memref<128x128xf32, #tpu.memory_space<vmem>>, vector<128x128xf32>
    %cst = arith.constant dense<0.000000e+00> : vector<128x128xf32>
    %5 = tpu.matmul %3, %4, %cst {dimension_numbers = #tpu.dot_dimension_numbers<[1], [0], [0], [1], [0, 0, 1, 1], [], []>, precision = #tpu.contract_precision<fp32>} : vector<128x128xf32>, vector<128x128xf32>, vector<128x128xf32> -> vector<128x128xf32>
    %c0_4 = arith.constant 0 : index
    %c0_5 = arith.constant 0 : index
    %6 = vector.load %arg4[%c0_4, %c0_5] : memref<128x1xi32, #tpu.memory_space<vmem>>, vector<128x1xi32>
    %c0_6 = arith.constant 0 : index
    %c0_7 = arith.constant 0 : index
    %7 = vector.load %arg5[%c0_6, %c0_7] : memref<1x128xi32, #tpu.memory_space<vmem>>, vector<1x128xi32>
    %8 = vector.broadcast %6 : vector<128x1xi32> to vector<128x128xi32>
    %9 = vector.broadcast %7 : vector<1x128xi32> to vector<128x128xi32>
    %10 = arith.cmpi ne, %8, %9 : vector<128x128xi32>
    %11 = math.exp %5 : vector<128x128xf32>
    %c0_8 = arith.constant 0 : index
    %c0_9 = arith.constant 0 : index
    %12 = vector.load %arg7[%c0_8, %c0_9] : memref<128x1xf32, #tpu.memory_space<vmem>>, vector<128x1xf32>
    %cst_10 = arith.constant 0.000000e+00 : f32
    %13 = vector.broadcast %cst_10 : f32 to vector<128x128xf32>
    %14 = arith.select %10, %11, %13 : vector<128x128xi1>, vector<128x128xf32>
    %cst_11 = arith.constant dense<0.000000e+00> : vector<128xf32>
    %15 = vector.multi_reduction <add>, %14, %cst_11 [1] : vector<128x128xf32> to vector<128xf32>
    %16 = vector.shape_cast %15 : vector<128xf32> to vector<128x1xf32>
    %17 = arith.addf %12, %16 : vector<128x1xf32>
    %c0_12 = arith.constant 0 : index
    %c0_13 = arith.constant 0 : index
    %18 = vector.load %arg7[%c0_12, %c0_13] : memref<128x1xf32, #tpu.memory_space<vmem>>, vector<128x1xf32>
    tpu.vector_store %arg7[%c0_12, %c0_13], %17 {strides = array<i32>} : memref<128x1xf32, #tpu.memory_space<vmem>>, vector<128x1xf32>,
    %c0_i32_14 = arith.constant 0 : i32
    %19 = arith.cmpi eq, %arg1, %c0_i32_14 : i32
    %20 = arith.extui %19 : i1 to i32
    %c0_i32_15 = arith.constant 0 : i32
    %21 = arith.cmpi ne, %20, %c0_i32_15 : i32
    scf.if %21 {
      %c0_16 = arith.constant 0 : index
      %c0_17 = arith.constant 0 : index
      %22 = vector.load %arg7[%c0_16, %c0_17] : memref<128x1xf32, #tpu.memory_space<vmem>>, vector<128x1xf32>
      %cst_18 = arith.constant 1.200000e+02 : f32
      %23 = vector.broadcast %cst_18 : f32 to vector<128x1xf32>
      %24 = arith.subf %22, %23 : vector<128x1xf32>
      %c0_19 = arith.constant 0 : index
      %c0_20 = arith.constant 0 : index
      %25 = vector.load %arg6[%c0_19, %c0_20] : memref<128x1xf32, #tpu.memory_space<vmem>>, vector<128x1xf32>
      tpu.vector_store %arg6[%c0_19, %c0_20], %24 {strides = array<i32>} : memref<128x1xf32, #tpu.memory_space<vmem>>, vector<128x1xf32>,
    } else {
    }
    return
  }
  func.func @transform_0(%arg0: i32, %arg1: i32) -> (i32, i32) {
    %c0_i32 = arith.constant 0 : i32
    %c0_i32_0 = arith.constant 0 : i32
    return %arg0, %c0_i32 : i32, i32
  }
  func.func @transform_1(%arg0: i32, %arg1: i32) -> (i32, i32) {
    %c0_i32 = arith.constant 0 : i32
    %c0_i32_0 = arith.constant 0 : i32
    return %c0_i32, %arg1 : i32, i32
  }
  func.func @transform_2(%arg0: i32, %arg1: i32) -> (i32, i32) {
    %c0_i32 = arith.constant 0 : i32
    %c0_i32_0 = arith.constant 0 : i32
    return %arg0, %c0_i32 : i32, i32
  }
  func.func @transform_3(%arg0: i32, %arg1: i32) -> (i32, i32) {
    %c0_i32 = arith.constant 0 : i32
    %c0_i32_0 = arith.constant 0 : i32
    return %c0_i32, %arg1 : i32, i32
  }
  func.func @transform_4(%arg0: i32, %arg1: i32) -> (i32, i32) {
    %c0_i32 = arith.constant 0 : i32
    %c0_i32_0 = arith.constant 0 : i32
    return %arg0, %c0_i32 : i32, i32
  }
}

</mosaic_0001>

<bundles_post_ra>
// kernel: tpu_custom_call.1
= control target key start
LH: loop header
LB: loop body
LE: loop exit
PB: predicated region body
PF: predicated region fallthrough
CT: control target
= control target key end

     0   :  { %9 = vsyncpa [#allocation4], 0  ;;  %s2520_s15 = smov [#allocation3]   ;;  %s3296_s0 = inlined_call_operand.vmem [shape: f32[128,128], index: 0, kind: input, shape index: {}]   ;;  %s3297_s1 = inlined_call_operand.hbm [shape: f32[128,128], index: 1, kind: input, shape index: {}]   ;;  %s3298_s2 = inlined_call_operand.vmem [shape: s32[128,1], index: 2, kind: input, shape index: {}]   ;;  %s3299_s3 = inlined_call_operand.vmem [shape: s32[1,128], index: 3, kind: input, shape index: {}]   ;;  %s3300_s4 = inlined_call_operand.vmem [shape: f32[128,1], index: 4, kind: output, shape index: {}]  }
   0x1   :  { %s17_s16 = sshll.u32 %s2520_s15, 4  ;;  %s2496_s19 = scalar_lea.hbm %s3297_s1, 2048  ;;  %s18_s16 = int_to_ptr.vmem [resolvable:$true] %s17_s16 }
   0x2   :  { %p2497_p0 = scmp.ne.s32.totalorder %s3297_s1, %s2496_s19  ;;  %p2500_p1 = scmp.lt.u32.totalorder %s2496_s19, %s3297_s1 }
   0x4   :  { %p2502_p2 = pnand %p2500_p1, %p2497_p0 }
   0x6   :  { %2505 = shalt.err (!%p2502_p2)
}
   0x7   :  { %s2506_s24 = scalar_lea.vmem %s18_s16, 2048  ;;  %p2511_p4 = scmp.lt.s32.totalorder %s18_s16, %s18_s16 }
   0x8   :  { %p2507_p3 = scmp.ne.s32.totalorder %s18_s16, %s2506_s24  ;;  %p2512_p5 = scmp.lt.s32.totalorder %s2506_s24, %s2506_s24 }
   0xa   :  { %p2513_p6 = por %p2512_p5, %p2511_p4 }
   0xc   :  { %p2514_p7 = pnand %p2513_p6, %p2507_p3 }
   0xe   :  { %2517 = shalt.err (!%p2514_p7)
}
   0xf   :  { %s2521_s25 = smov 128   ;;  %s2522_s26 = smov 8  }
  0x10   :  { %23 = dma.hbm_to_vmem [thread:$0]  %s3297_s1, 2048, %s18_s16, [#allocation4], %s2521_s25, %s2521_s25, %s2522_s26  }
  0x11   :  { %2518 = dma.done.wait [#allocation4], 2048  }
  0x12   :  { %2519 = vsyncadd [#allocation4], 4294965248  ;;  %v68_v0 = vld [vmem:[#allocation3] sm:$0xff]  ;;  %v69_v1 = vld [vmem:[#allocation3 + $0x8] sm:$0xff]  ;;  %vm35_vm0 = vcmask 7168  }
  0x13   :  { %v70_v2 = vld [vmem:[#allocation3 + $0x10] sm:$0xff]  ;;  %v85_v3 = vand.u32 4294901760, %v68_v0  ;;  %v88_v4 = vand.u32 4294901760, %v69_v1  ;;  %v71_v5 = vld [vmem:[#allocation3 + $0x18] sm:$0xff]  ;;  %v2562_v7 = vld [vmem:[#allocation3 + $0x20] sm:$0xff] }
  0x14   :  { %v91_v6 = vand.u32 4294901760, %v70_v2  ;;  %v2564_v8 = vld [vmem:[#allocation3 + $0x28] sm:$0xff]  ;;  %v94_v9 = vand.u32 4294901760, %v71_v5  ;;  %v97_v11 = vand.u32 4294901760, %v2562_v7  ;;  %v2572_v14 = vld [vmem:[#allocation3 + $0x30] sm:$0xff]  ;;  %v2574_v15 = vld [vmem:[#allocation3 + $0x38] sm:$0xff] }
  0x15   :  { %v2566_v10 = vpack.c.bf16 %v88_v4, %v85_v3  ;;  %v100_v12 = vand.u32 4294901760, %v2564_v8  ;;  %v52_v16 = vld [vmem:[%s3296_s0] sm:$0xff]  ;;  %v103_v19 = vand.u32 4294901760, %v2572_v14  ;;  %v106_v20 = vand.u32 4294901760, %v2574_v15  ;;  %v53_v21 = vld [vmem:[%s3296_s0 + $0x8] sm:$0xff]  ;;  %v2620_v30 = vld [vmem:[#allocation3 + $0x50] sm:$0xff] }
  0x16   :  { %v2570_v13 = vpack.c.bf16 %v94_v9, %v91_v6  ;;  %v2583_v17 = vand.u32 4294901760, %v52_v16  ;;  %v2598_v22 = vld [vmem:[#allocation3 + $0x40] sm:$0xff]  ;;  %v2600_v23 = vld [vmem:[#allocation3 + $0x48] sm:$0xff]  ;;  %v2608_v26 = vand.u32 4294901760, %v53_v21  ;;  %v54_v31 = vld [vmem:[%s3296_s0 + $0x10] sm:$0xff]  ;;  %v2631_v35 = vsub.f32 %v68_v0, %v85_v3 }
  0x17   :  { %2186 = vmatprep.subr.bf16.mxu1 %v2566_v10  ;;  %2282 = vmatprep.subr.bf16.mxu0 %v2566_v10  ;;  %v2591_v18 = vpack.c.bf16 %v100_v12, %v97_v11  ;;  %v2616_v27 = vpack.c.bf16 %v106_v20, %v103_v19  ;;  %v3311_v28 = vand.u32 4294901760, %v2598_v22  ;;  %v3309_v29 = vand.u32 4294901760, %v2600_v23  ;;  %v2625_v32 = vld [vmem:[#allocation3 + $0x58] sm:$0xff]  ;;  %v2638_v38 = vld [vmem:[#allocation3 + $0x60] sm:$0xff]  ;;  %v2640_v39 = vld [vmem:[#allocation3 + $0x68] sm:$0xff] }
  0x18   :  { %2188 = vmatpush3.bf16.msra.mxu1 %v2566_v10  ;;  %2284 = vmatpush3.bf16.msra.mxu0 %v2566_v10  ;;  %v2603_v24 = vsub.f32 %v52_v16, %v2583_v17  ;;  %v55_v34 = vld [vmem:[%s3296_s0 + $0x18] sm:$0xff]  ;;  %v2633_v36 = vsub.f32 %v69_v1, %v88_v4  ;;  %v3308_v37 = vand.u32 4294901760, %v2620_v30  ;;  %v2643_v41 = vsub.f32 %v53_v21, %v2608_v26  ;;  %v2656_v45 = vld [vmem:[#allocation3 + $0x70] sm:$0xff]  ;;  %v56_v50 = vld [vmem:[%s3296_s0 + $0x20] sm:$0xff] }
  0x19   :  { %2190 = vmatprep.subr.bf16.mxu1 %v2570_v13  ;;  %2286 = vmatprep.subr.bf16.mxu0 %v2570_v13  ;;  %3345 = vst [vmem:[#allocation7_spill] sm:$0xff] %v2616_v27  ;;  %v2645_v42 = vand.u32 4294901760, %v54_v31  ;;  %v2653_v43 = vpack.c.bf16 %v3309_v29, %v3311_v28  ;;  %v3306_v44 = vand.u32 4294901760, %v2625_v32  ;;  %v2658_v46 = vld [vmem:[#allocation3 + $0x78] sm:$0xff]  ;;  %v2660_v47 = vand.u32 4294901760, %v55_v34  ;;  %v57_v55 = vld [vmem:[%s3296_s0 + $0x28] sm:$0xff] }
  0x1a   :  { %3344 = vst [vmem:[#allocation6_spill] sm:$0xff] %v2603_v24  ;;  %v167_v25 = vand.u32 4294901760, %v2603_v24  ;;  %3346 = vst [vmem:[#allocation8_spill] sm:$0xff] %v2643_v41  ;;  %v2662_v48 = vsub.f32 %v70_v2, %v91_v6  ;;  %v2664_v49 = vsub.f32 %v71_v5, %v94_v9  ;;  %v3304_v51 = vand.u32 4294901760, %v2638_v38  ;;  %v58_v2 = vld [vmem:[%s3296_s0 + $0x30] sm:$0xff]  ;;  %v59_v9 = vld [vmem:[%s3296_s0 + $0x38] sm:$0xff] }
  0x1b   :  { %3347 = vst [vmem:[#allocation9_spill] sm:$0xff] %v2653_v43  ;;  %v3303_v52 = vand.u32 4294901760, %v2640_v39  ;;  %v328_v53 = vand.u32 4294901760, %v2631_v35  ;;  %v335_v54 = vand.u32 4294901760, %v2633_v36  ;;  %v3302_v56 = vand.u32 4294901760, %v2656_v45 }
  0x1c   :  { %2192 = vmatpush3.bf16.msra.mxu1 %v2570_v13  ;;  %2288 = vmatpush3.bf16.msra.mxu0 %v2570_v13  ;;  %v168_v33 = vsub.f32 %v2603_v24, %v167_v25  ;;  %v3301_v57 = vand.u32 4294901760, %v2658_v46  ;;  %v3305_v58 = vand.u32 4294901760, %v2643_v41  ;;  %v2682_v59 = vsub.f32 %v54_v31, %v2645_v42 }
  0x1d   :  { %2194 = vmatprep.subr.bf16.mxu1 %v2591_v18  ;;  %2290 = vmatprep.subr.bf16.mxu0 %v2591_v18  ;;  %v2690_v60 = vpack.c.bf16 %v3306_v44, %v3308_v37  ;;  %v2693_v61 = vsub.f32 %v55_v34, %v2660_v47  ;;  %v342_v62 = vand.u32 4294901760, %v2662_v48  ;;  %v2696_v63 = vand.u32 4294901760, %v56_v50 }
  0x1e   :  { %2049 = vmatprep.mubr.f32.mxu0 %v167_v25  ;;  %v169_v40 = vand.u32 4294901760, %v168_v33  ;;  %3348 = vst [vmem:[#allocation10_spill] sm:$0xff] %v2682_v59  ;;  %v349_v0 = vand.u32 4294901760, %v2664_v49  ;;  %v2699_v1 = vand.u32 4294901760, %v57_v55  ;;  %v329_v3 = vsub.f32 %v2631_v35, %v328_v53 }
  0x1f   :  { %3349 = vst [vmem:[#allocation11_spill] sm:$0xff] %v2690_v60  ;;  %3350 = vst [vmem:[#allocation12_spill] sm:$0xff] %v2693_v61  ;;  %v336_v4 = vsub.f32 %v2633_v36, %v335_v54  ;;  %v2709_v5 = vsub.f32 %v2562_v7, %v97_v11  ;;  %v2714_v6 = vsub.f32 %v2564_v8, %v100_v12  ;;  %v3307_v11 = vand.u32 4294901760, %v2682_v59 }
  0x20   :  { %2196 = vmatpush3.bf16.msra.mxu1 %v2591_v18  ;;  %2292 = vmatpush3.bf16.msra.mxu0 %v2591_v18  ;;  %v2725_v16 = vpack.c.bf16 %v3303_v52, %v3304_v51  ;;  %v2731_v7 = vpack.c.bf16 %v3301_v57, %v3302_v56  ;;  %v2736_v8 = vsub.f32 %v2643_v41, %v3305_v58  ;;  %v3310_v12 = vand.u32 4294901760, %v2693_v61 }
  0x21   :  { %2198 = vmatprep.subr.bf16.mxu1 %v2616_v27  ;;  %2294 = vmatprep.subr.bf16.mxu0 %v2616_v27  ;;  %v343_v21 = vsub.f32 %v2662_v48, %v342_v62  ;;  %v2744_v25 = vsub.f32 %v56_v50, %v2696_v63  ;;  %v2746_v31 = vand.u32 4294901760, %v58_v2  ;;  %v350_v33 = vsub.f32 %v2664_v49, %v349_v0 }
  0x22   :  { %1881 = vmatprep.mubr.f32.mxu1 %v169_v40  ;;  %3351 = vst [vmem:[#allocation13_spill] sm:$0xff] %v2725_v16  ;;  %3352 = vst [vmem:[#allocation14_spill] sm:$0xff] %v2731_v7  ;;  %v2750_v34 = vsub.f32 %v57_v55, %v2699_v1  ;;  %v2752_v40 = vand.u32 4294901760, %v59_v9  ;;  %v2757_v57 = vsub.f32 %v2572_v14, %v103_v19  ;;  %v330_v56 = vand.u32 4294901760, %v329_v3  ;;  %v60_v19 = vld [vmem:[%s3296_s0 + $0x40] sm:$0xff] }
  0x23   :  { %3353 = vst [vmem:[#allocation15_spill] sm:$0xff] %v2744_v25  ;;  %3354 = vst [vmem:[#allocation16_spill] sm:$0xff] %v2746_v31  ;;  %v337_v52 = vand.u32 4294901760, %v336_v4  ;;  %v356_v51 = vand.u32 4294901760, %v2709_v5  ;;  %v363_v50 = vand.u32 4294901760, %v2714_v6  ;;  %v179_v55 = vand.u32 4294901760, %v2736_v8 }
  0x24   :  { %2200 = vmatpush3.bf16.msra.mxu1 %v2616_v27  ;;  %2296 = vmatpush3.bf16.msra.mxu0 %v2616_v27  ;;  %3355 = vst [vmem:[#allocation17_spill] sm:$0xff] %v2750_v34  ;;  %3356 = vst [vmem:[#allocation18_spill] sm:$0xff] %v2752_v40  ;;  %v2764_v58 = vpack.c.bf16 %v335_v54, %v328_v53  ;;  %v2769_v44 = vsub.f32 %v2682_v59, %v3307_v11  ;;  %v344_v54 = vand.u32 4294901760, %v343_v21 }
  0x25   :  { %2202 = vmatprep.subr.bf16.mxu1 %v2653_v43  ;;  %2298 = vmatprep.subr.bf16.mxu0 %v2653_v43  ;;  %v2774_v14 = vsub.f32 %v2574_v15, %v106_v20  ;;  %v2784_v53 = vsub.f32 %v2693_v61, %v3310_v12  ;;  %v3315_v3 = vand.u32 4294901760, %v2744_v25  ;;  %v2788_v4 = vsub.f32 %v58_v2, %v2746_v31 }
  0x26   :  { %v351_v15 = vand.u32 4294901760, %v350_v33  ;;  %v2792_v8 = vsub.f32 %v59_v9, %v2752_v40  ;;  %v2217_v37 = vpack.c.bf16 %v337_v52, %v330_v56  ;;  %v357_v29 = vsub.f32 %v2709_v5, %v356_v51  ;;  %v61_v9 = vld [vmem:[%s3296_s0 + $0x48] sm:$0xff] }
  0x27   :  { %3357 = vst [vmem:[#allocation19_spill] sm:$0xff] %v2788_v4  ;;  %v364_v12 = vsub.f32 %v2714_v6, %v363_v50  ;;  %v2797_v28 = vand.u32 4294901760, %v60_v19  ;;  %v189_v2 = vand.u32 4294901760, %v2769_v44  ;;  %v377_v21 = vand.u32 4294901760, %v2774_v14 }
  0x28   :  { %2204 = vmatpush3.bf16.msra.mxu1 %v2653_v43  ;;  %2300 = vmatpush3.bf16.msra.mxu0 %v2653_v43  ;;  %3358 = vst [vmem:[#allocation20_spill] sm:$0xff] %v2792_v8  ;;  %v3360_v52 = vand.u32 4294901760, %v2598_v22  ;;  %v3361_v33 = vand.u32 4294901760, %v2600_v23  ;;  %v199_v44 = vand.u32 4294901760, %v2784_v53  ;;  %v2317_v20 = vpack.c.bf16 %v349_v0, %v342_v62 }
  0x29   :  { %2206 = vmatprep.subr.bf16.mxu1 %v2690_v60  ;;  %2302 = vmatprep.subr.bf16.mxu0 %v2690_v60  ;;  %3359 = vst [vmem:[#allocation21_spill] sm:$0xff] %v2797_v28  ;;  %v2822_v24 = vsub.f32 %v2744_v25, %v3315_v3  ;;  %v3363_v62 = vand.u32 4294901760, %v2757_v57  ;;  %v358_v3 = vand.u32 4294901760, %v357_v29  ;;  %v2840_v43 = vand.u32 4294901760, %v61_v9  ;;  %v63_v29 = vld [vmem:[%s3296_s0 + $0x58] sm:$0xff] }
  0x2a   :  { %v2809_v56 = vsub.f32 %v2598_v22, %v3360_v52  ;;  %v2814_v11 = vsub.f32 %v2600_v23, %v3361_v33  ;;  %v62_v52 = vld [vmem:[%s3296_s0 + $0x50] sm:$0xff]  ;;  %v2221_v23 = vpack.c.bf16 %v351_v15, %v344_v54  ;;  %v3362_v33 = vand.u32 4294901760, %v2750_v34 }
  0x2b   :  { %v371_v0 = vsub.f32 %v2757_v57, %v3363_v62  ;;  %v2838_v22 = vsub.f32 %v60_v19, %v2797_v28  ;;  %v378_v54 = vsub.f32 %v2774_v14, %v377_v21  ;;  %v2847_v53 = vand.u32 4294901760, %v62_v52 }
  0x2c   :  { %2208 = vmatpush3.bf16.msra.mxu1 %v2690_v60  ;;  %2304 = vmatpush3.bf16.msra.mxu0 %v2690_v60  ;;  %v365_v60 = vand.u32 4294901760, %v364_v12  ;;  %v209_v12 = vand.u32 4294901760, %v2822_v24  ;;  %v2854_v19 = vpack.c.bf16 %v363_v50, %v356_v51  ;;  %v3364_v62 = vand.u32 4294901760, %v2788_v4 }
  0x2d   :  { %2210 = vmatprep.subr.bf16.mxu1 %v2725_v16  ;;  %2306 = vmatprep.subr.bf16.mxu0 %v2725_v16  ;;  %v3366_v40 = vand.u32 4294901760, %v2792_v8  ;;  %v372_v24 = vand.u32 4294901760, %v371_v0  ;;  %v3367_v51 = vand.u32 4294901760, %v2625_v32  ;;  %v2886_v0 = vand.u32 4294901760, %v63_v29 }
  0x2f   :  { %v2870_v27 = vsub.f32 %v2792_v8, %v3366_v40  ;;  %v2875_v50 = vsub.f32 %v2625_v32, %v3367_v51  ;;  %v2884_v40 = vsub.f32 %v61_v9, %v2840_v43  ;;  %v379_v32 = vand.u32 4294901760, %v378_v54 }
  0x30   :  { %2212 = vmatpush3.bf16.msra.mxu1 %v2725_v16  ;;  %2308 = vmatpush3.bf16.msra.mxu0 %v2725_v16  ;;  %v2831_v16 = vsub.f32 %v2750_v34, %v3362_v33  ;;  %v3365_v33 = vand.u32 4294901760, %v2620_v30  ;;  %v3369_v51 = vand.u32 4294901760, %v2809_v56 }
  0x31   :  { %2214 = vmatprep.subr.bf16.mxu1 %v2731_v7  ;;  %2310 = vmatprep.subr.bf16.mxu0 %v2731_v7 }
  0x32   :  { %v2864_v15 = vsub.f32 %v2620_v30, %v3365_v33  ;;  %v219_v28 = vand.u32 4294901760, %v2831_v16  ;;  %v3368_v30 = vand.u32 4294901760, %v2643_v41  ;;  %v2225_v16 = vpack.c.bf16 %v365_v60, %v358_v3  ;;  %v65_v3 = vld [vmem:[%s3296_s0 + $0x68] sm:$0xff] }
  0x33   :  { %v385_v31 = vsub.f32 %v2809_v56, %v3369_v51  ;;  %v2896_v60 = vsub.f32 %v62_v52, %v2847_v53  ;;  %v3372_v51 = vand.u32 4294901760, %v2638_v38  ;;  %v239_v52 = vand.u32 4294901760, %v2870_v27 }
  0x34   :  { %2216 = vmatpush3.bf16.msra.mxu1 %v2731_v7  ;;  %2312 = vmatpush3.bf16.msra.mxu0 %v2731_v7  ;;  %v2859_v7 = vsub.f32 %v2788_v4, %v3364_v62  ;;  %v64_v62 = vld [vmem:[%s3296_s0 + $0x60] sm:$0xff]  ;;  %v3376_v27 = vand.u32 4294901760, %v2838_v22 }
  0x35   :  { %2218 = vmatprep.subr.bf16.mxu1 %v2217_v37  ;;  %2314 = vmatprep.subr.bf16.mxu0 %v2764_v58  ;;  %v2905_v54 = vand.u32 4294901760, %v64_v62 }
  0x37   :  { %1882 = vmatmul.mubr.f32.vlgmr.msra.gmra.mrb[0].mxu1 %v179_v55  ;;  %2050 = vmatmul.mubr.f32.vlgmr.msra.gmra.mrb[0].mxu0 %v3368_v30  ;;  %v3370_v55 = vand.u32 4294901760, %v2814_v11 }
  0x38   :  { %2220 = vmatpush3.bf16.msra.mxu1 %v2217_v37  ;;  %2316 = vmatpush3.bf16.msra.mxu0 %v2764_v58  ;;  %v3371_v37 = vand.u32 4294901760, %v2682_v59  ;;  %v229_v58 = vand.u32 4294901760, %v2859_v7  ;;  %v3374_v7 = vand.u32 4294901760, %v2640_v39  ;;  %v66_v59 = vld [vmem:[%s3296_s0 + $0x70] sm:$0xff] }
  0x39   :  { %v392_v30 = vsub.f32 %v2814_v11, %v3370_v55  ;;  %1884 = vmatprep.mubr.f32.mxu1 %v189_v2  ;;  %v2910_v55 = vsub.f32 %v2638_v38, %v3372_v51  ;;  %2222 = vmatprep.subr.bf16.mxu1 %v2221_v23  ;;  %v3373_v2 = vand.u32 4294901760, %v2757_v57  ;;  %v3375_v38 = vand.u32 4294901760, %v2693_v61 }
  0x3a   :  { %2052 = vmatprep.mubr.f32.mxu0 %v3371_v37  ;;  %2318 = vmatprep.subr.bf16.mxu0 %v2317_v20  ;;  %v2919_v9 = vsub.f32 %v2640_v39, %v3374_v7  ;;  %v248_v51 = vsub.f32 %v2838_v22, %v3376_v27  ;;  %v2933_v37 = vand.u32 4294901760, %v65_v3  ;;  %v2229_v39 = vpack.c.bf16 %v379_v32, %v372_v24 }
  0x3b   :  { %v2325_v33 = vpack.c.bf16 %v377_v21, %v3373_v2  ;;  %1885 = vmatmul.mubr.f32.gmra.mrb[2].mxu1 %v199_v44  ;;  %2053 = vmatmul.mubr.f32.gmra.mrb[2].mxu0 %v3375_v38  ;;  %v2931_v2 = vsub.f32 %v63_v29, %v2886_v0  ;;  %v386_v7 = vand.u32 4294901760, %v385_v31  ;;  %v393_v41 = vand.u32 4294901760, %v392_v30  ;;  %v67_v38 = vld [vmem:[%s3296_s0 + $0x78] sm:$0xff] }
  0x3c   :  { %3378 = vst [vmem:[#allocation23_spill] sm:$0xff] %v2933_v37  ;;  %2224 = vmatpush3.bf16.msra.mxu1 %v2221_v23  ;;  %2320 = vmatpush3.bf16.msra.mxu0 %v2317_v20  ;;  %v3379_v27 = vand.u32 4294901760, %v2744_v25  ;;  %v3380_v29 = vand.u32 4294901760, %v2864_v15  ;;  %v2945_v23 = vsub.f32 %v64_v62, %v2905_v54  ;;  %v2948_v20 = vand.u32 4294901760, %v66_v59 }
  0x3d   :  { %3377 = vst [vmem:[#allocation22_spill] sm:$0xff] %v2931_v2  ;;  %1887 = vmatprep.mubr.f32.mxu1 %v209_v12  ;;  %2226 = vmatprep.subr.bf16.mxu1 %v2225_v16  ;;  %v3383_v24 = vand.u32 4294901760, %v2875_v50  ;;  %v419_v32 = vand.u32 4294901760, %v2919_v9  ;;  %v3384_v30 = vand.u32 4294901760, %v2656_v45  ;;  %v3385_v62 = vand.u32 4294901760, %v2658_v46 }
  0x3e   :  { %2055 = vmatprep.mubr.f32.mxu0 %v3379_v27  ;;  %v399_v21 = vsub.f32 %v2864_v15, %v3380_v29  ;;  %3381 = vst [vmem:[#allocation24_spill] sm:$0xff] %v2945_v23  ;;  %3382 = vst [vmem:[#allocation25_spill] sm:$0xff] %v2948_v20  ;;  %2322 = vmatprep.subr.bf16.mxu0 %v2854_v19  ;;  %v3386_v31 = vand.u32 4294901760, %v2750_v34  ;;  %v3387_v44 = vand.u32 4294901760, %v2884_v40  ;;  %v277_v25 = vand.u32 4294901760, %v2931_v2 }
  0x3f   :  { %v406_v12 = vsub.f32 %v2875_v50, %v3383_v24  ;;  %v2958_v27 = vsub.f32 %v2656_v45, %v3384_v30  ;;  %v2963_v29 = vsub.f32 %v2658_v46, %v3385_v62  ;;  %1888 = vmatmul.mubr.f32.gmra.mrb[4].mxu1 %v219_v28  ;;  %v2972_v61 = vsub.f32 %v65_v3, %v2933_v37 }
  0x40   :  { %2056 = vmatmul.mubr.f32.gmra.mrb[4].mxu0 %v3386_v31  ;;  %v258_v24 = vsub.f32 %v2884_v40, %v3387_v44  ;;  %v2974_v45 = vand.u32 4294901760, %v67_v38  ;;  %2228 = vmatpush3.bf16.msra.mxu1 %v2225_v16  ;;  %v249_v46 = vand.u32 4294901760, %v248_v51  ;;  %v2233_v30 = vpack.c.bf16 %v393_v41, %v386_v7 }
  0x41   :  { %3388 = vst [vmem:[#allocation26_spill] sm:$0xff] %v2972_v61  ;;  %2324 = vmatpush3.bf16.msra.mxu0 %v2854_v19  ;;  %v3389_v28 = vand.u32 4294901760, %v2809_v56  ;;  %v3390_v31 = vand.u32 4294901760, %v2814_v11  ;;  %v3391_v34 = vand.u32 4294901760, %v2896_v60  ;;  %1890 = vmatprep.mubr.f32.mxu1 %v229_v58  ;;  %v3392_v3 = vand.u32 4294901760, %v2788_v4 }
  0x42   :  { %v400_v37 = vand.u32 4294901760, %v399_v21  ;;  %v287_v16 = vand.u32 4294901760, %v2945_v23  ;;  %v3393_v19 = vand.u32 4294901760, %v2910_v55  ;;  %v2991_v51 = vsub.f32 %v66_v59, %v2948_v20  ;;  %2230 = vmatprep.subr.bf16.mxu1 %v2229_v39  ;;  %2326 = vmatprep.subr.bf16.mxu0 %v2325_v33 }
  0x43   :  { %v2329_v62 = vpack.c.bf16 %v3390_v31, %v3389_v28  ;;  %v268_v44 = vsub.f32 %v2896_v60, %v3391_v34  ;;  %2058 = vmatprep.mubr.f32.mxu0 %v3392_v3  ;;  %v407_v7 = vand.u32 4294901760, %v406_v12  ;;  %v420_v28 = vsub.f32 %v2919_v9, %v419_v32  ;;  %1891 = vmatmul.mubr.f32.gmra.mrb[6].mxu1 %v239_v52 }
  0x44   :  { %v413_v41 = vsub.f32 %v2910_v55, %v3393_v19  ;;  %v426_v34 = vand.u32 4294901760, %v2958_v27  ;;  %v433_v58 = vand.u32 4294901760, %v2963_v29  ;;  %v3394_v21 = vand.u32 4294901760, %v2792_v8  ;;  %2232 = vmatpush3.bf16.msra.mxu1 %v2229_v39  ;;  %1893 = vmatprep.mubr.f32.mxu1 %v249_v46 }
  0x45   :  { %v259_v31 = vand.u32 4294901760, %v258_v24  ;;  %v278_v3 = vsub.f32 %v2931_v2, %v277_v25  ;;  %v297_v19 = vand.u32 4294901760, %v2972_v61  ;;  %v3001_v59 = vsub.f32 %v67_v38, %v2974_v45  ;;  %2328 = vmatpush3.bf16.msra.mxu0 %v2325_v33  ;;  %2234 = vmatprep.subr.bf16.mxu1 %v2233_v30 }
  0x46   :  { %2059 = vmatmul.mubr.f32.gmra.mrb[6].mxu0 %v3394_v21  ;;  %v269_v12 = vand.u32 4294901760, %v268_v44  ;;  %v3395_v4 = vand.u32 4294901760, %v2838_v22  ;;  %v3396_v52 = vand.u32 4294901760, %v2864_v15  ;;  %v3397_v8 = vand.u32 4294901760, %v2875_v50  ;;  %2330 = vmatprep.subr.bf16.mxu0 %v2329_v62 }
  0x47   :  { %v288_v24 = vsub.f32 %v2945_v23, %v287_v16  ;;  %v414_v2 = vand.u32 4294901760, %v413_v41  ;;  %v307_v20 = vand.u32 4294901760, %v2991_v51  ;;  %v2237_v38 = vpack.c.bf16 %v407_v7, %v400_v37  ;;  %1894 = vmatmul.mubr.f32.gmra.mrb[8].mxu1 %v259_v31 }
  0x48   :  { %2061 = vmatprep.mubr.f32.mxu0 %v3395_v4  ;;  %v2333_v21 = vpack.c.bf16 %v3397_v8, %v3396_v52  ;;  %v421_v39 = vand.u32 4294901760, %v420_v28  ;;  %v427_v33 = vsub.f32 %v2958_v27, %v426_v34  ;;  %v434_v46 = vsub.f32 %v2963_v29, %v433_v58  ;;  %2236 = vmatpush3.bf16.msra.mxu1 %v2233_v30 }
  0x49   :  { %v3398_v4 = vand.u32 4294901760, %v2884_v40  ;;  %v279_v44 = vand.u32 4294901760, %v278_v3  ;;  %v298_v8 = vsub.f32 %v2972_v61, %v297_v19  ;;  %v317_v52 = vand.u32 4294901760, %v3001_v59  ;;  %2332 = vmatpush3.bf16.msra.mxu0 %v2329_v62  ;;  %1896 = vmatprep.mubr.f32.mxu1 %v269_v12 }
  0x4a   :  { %v3399_v41 = vand.u32 4294901760, %v2896_v60  ;;  %v289_v37 = vand.u32 4294901760, %v288_v24  ;;  %v308_v7 = vsub.f32 %v2991_v51, %v307_v20  ;;  %2238 = vmatprep.subr.bf16.mxu1 %v2237_v38  ;;  %2334 = vmatprep.subr.bf16.mxu0 %v2333_v21  ;;  %v2241_v28 = vpack.c.bf16 %v421_v39, %v414_v2  ;;  %v1378_v39 = vld [vmem:[%s3298_s2 + $0x40] sm:$0xff] }
  0x4b   :  { %2062 = vmatmul.mubr.f32.gmra.mrb[8].mxu0 %v3398_v4  ;;  %v3400_v31 = vand.u32 4294901760, %v2910_v55  ;;  %v428_v3 = vand.u32 4294901760, %v427_v33  ;;  %v435_v23 = vand.u32 4294901760, %v434_v46  ;;  %1897 = vmatmul.mubr.f32.gmra.mrb[10].mxu1 %v279_v44  ;;  %v299_v61 = vand.u32 4294901760, %v298_v8  ;;  %v1380_v33 = vld [vmem:[%s3298_s2 + $0x50] sm:$0xff]  ;;  %v3419_v46 = vld [vmem:[#allocation22_spill] sm:$0xff] }
  0x4c   :  { %2064 = vmatprep.mubr.f32.mxu0 %v3399_v41  ;;  %v318_v30 = vsub.f32 %v3001_v59, %v317_v52  ;;  %2240 = vmatpush3.bf16.msra.mxu1 %v2237_v38  ;;  %v309_v62 = vand.u32 4294901760, %v308_v7  ;;  %v2341_v24 = vpack.c.bf16 %v433_v58, %v426_v34  ;;  %v3414_v34 = vld [vmem:[#allocation12_spill] sm:$0xff]  ;;  %v3415_v58 = vld [vmem:[#allocation15_spill] sm:$0xff] }
  0x4d   :  { %v2337_v4 = vpack.c.bf16 %v419_v32, %v3400_v31  ;;  %2336 = vmatpush3.bf16.msra.mxu0 %v2333_v21  ;;  %1899 = vmatprep.mubr.f32.mxu1 %v289_v37  ;;  %v2245_v12 = vpack.c.bf16 %v435_v23, %v428_v3  ;;  %v2523_v23 = vmov 0   ;;  %v1370_v32 = vld [vmem:[%s3298_s2] sm:$0xff]  ;;  %v3417_v21 = vld [vmem:[#allocation19_spill] sm:$0xff]  ;;  %v3418_v38 = vld [vmem:[#allocation20_spill] sm:$0xff] }
  0x4e   :  { %2242 = vmatprep.subr.bf16.mxu1 %v2241_v28  ;;  %v319_v2 = vand.u32 4294901760, %v318_v30  ;;  %2463 = vset.pattern.permute.xlu1 %v2523_v23 }
  0x4f   :  { %2065 = vmatmul.mubr.f32.gmra.mrb[10].mxu0 %v277_v25  ;;  %2338 = vmatprep.subr.bf16.mxu0 %v2337_v4  ;;  %v2249_v25 = vpack.c.bf16 %v2633_v36, %v2631_v35  ;;  %v2257_v35 = vpack.c.bf16 %v2714_v6, %v2709_v5  ;;  %v3401_v36 = vld [vmem:[#allocation16_spill] sm:$0xff]  ;;  %v2269_v5 = vpack.c.bf16 %v2875_v50, %v2864_v15  ;;  %v3406_v6 = vld [vmem:[#allocation11_spill] sm:$0xff]  ;;  %v3409_v50 = vld [vmem:[#allocation25_spill] sm:$0xff] }
  0x50   :  { %2067 = vmatprep.mubr.f32.mxu0 %v287_v16  ;;  %1900 = vmatmul.mubr.f32.gmra.mrb[12].mxu1 %v299_v61  ;;  %v2253_v61 = vpack.c.bf16 %v2664_v49, %v2662_v48  ;;  %v2265_v48 = vpack.c.bf16 %v2814_v11, %v2809_v56  ;;  %v3403_v49 = vld [vmem:[#allocation18_spill] sm:$0xff]  ;;  %v2273_v11 = vpack.c.bf16 %v2919_v9, %v2910_v55  ;;  %v3408_v15 = vld [vmem:[#allocation23_spill] sm:$0xff] }
  0x51   :  { %2244 = vmatpush3.bf16.msra.mxu1 %v2241_v28  ;;  %2340 = vmatpush3.bf16.msra.mxu0 %v2337_v4  ;;  %v2277_v56 = vpack.c.bf16 %v2963_v29, %v2958_v27  ;;  %v3410_v9 = vld [vmem:[#allocation14_spill] sm:$0xff]  ;;  %v3412_v27 = vld [vmem:[#allocation8_spill] sm:$0xff]  ;;  %v1371_v16 = vld [vmem:[%s3298_s2 + $0x8] sm:$0xff] }
  0x52   :  { %1902 = vmatprep.mubr.f32.mxu1 %v309_v62  ;;  %2246 = vmatprep.subr.bf16.mxu1 %v2245_v12  ;;  %v3411_v55 = vld [vmem:[#allocation6_spill] sm:$0xff] }
  0x53   :  { %2068 = vmatmul.mubr.f32.gmra.mrb[12].mxu0 %v297_v19  ;;  %2342 = vmatprep.subr.bf16.mxu0 %v2341_v24  ;;  %v3413_v29 = vld [vmem:[#allocation10_spill] sm:$0xff]  ;;  %v3416_v19 = vld [vmem:[#allocation17_spill] sm:$0xff] }
  0x54   :  { %2070 = vmatprep.mubr.f32.mxu0 %v307_v20  ;;  %1903 = vmatmul.mubr.f32.gmra.mrb[14].mxu1 %v319_v2  ;;  %v1372_v20 = vld [vmem:[%s3298_s2 + $0x10] sm:$0xff] }
  0x55   :  { %2248 = vmatpush3.bf16.msra.mxu1 %v2245_v12  ;;  %2344 = vmatpush3.bf16.msra.mxu0 %v2341_v24 }
  0x56   :  { %1937 = vmatprep.mubr.f32.mxu1 %v2583_v17  ;;  %2250 = vmatprep.subr.bf16.mxu1 %v2249_v25 }
  0x57   :  { %2071 = vmatmul.mubr.f32.gmra.mrb[14].mxu0 %v317_v52  ;;  %2346 = vmatprep.subr.bf16.mxu0 %v2566_v10 }
  0x58   :  { %2105 = vmatprep.mubr.f32.mxu0 %v2583_v17  ;;  %1938 = vmatmul.mubr.f32.vlgmr.msra.gmra.mrb[0].mxu1 %v2608_v26 }
  0x59   :  { %2252 = vmatpush3.bf16.msra.mxu1 %v2249_v25  ;;  %1940 = vmatprep.mubr.f32.mxu1 %v2645_v42 }
  0x5a   :  { %2254 = vmatprep.subr.bf16.mxu1 %v2253_v61  ;;  %2462 = vset.pattern.permute.xlu0 %v2523_v23 }
  0x5b   :  { %2106 = vmatmul.mubr.f32.vlgmr.msra.gmra.mrb[0].mxu0 %v2608_v26  ;;  %1394 = vperm.xlu1 %2463, %v1372_v20  }
  0x5c   :  { %2348 = vmatpush3.bf16.msra.mxu0 %v2566_v10  ;;  %2108 = vmatprep.mubr.f32.mxu0 %v2645_v42  ;;  %v2261_v10 = vpack.c.bf16 %v2774_v14, %v2757_v57  ;;  %v3404_v57 = vld [vmem:[#allocation21_spill] sm:$0xff] }
  0x5d   :  { %2350 = vmatprep.subr.bf16.mxu0 %v2570_v13  ;;  %1941 = vmatmul.mubr.f32.gmra.mrb[2].mxu1 %v2660_v47  ;;  %v3407_v14 = vld [vmem:[#allocation13_spill] sm:$0xff] }
  0x5e   :  { %2256 = vmatpush3.bf16.msra.mxu1 %v2253_v61  ;;  %1943 = vmatprep.mubr.f32.mxu1 %v2696_v63 }
  0x5f   :  { %2109 = vmatmul.mubr.f32.gmra.mrb[2].mxu0 %v2660_v47  ;;  %2258 = vmatprep.subr.bf16.mxu1 %v2257_v35 }
  0x60   :  { %2352 = vmatpush3.bf16.msra.mxu0 %v2570_v13  ;;  %2111 = vmatprep.mubr.f32.mxu0 %v2696_v63  ;;  %v3402_v13 = vld [vmem:[#allocation7_spill] sm:$0xff] }
  0x61   :  { %2354 = vmatprep.subr.bf16.mxu0 %v2591_v18  ;;  %1944 = vmatmul.mubr.f32.gmra.mrb[4].mxu1 %v2699_v1 }
  0x62   :  { %2260 = vmatpush3.bf16.msra.mxu1 %v2257_v35  ;;  %1946 = vmatprep.mubr.f32.mxu1 %v3401_v36 }
  0x63   :  { %2112 = vmatmul.mubr.f32.gmra.mrb[4].mxu0 %v2699_v1  ;;  %2262 = vmatprep.subr.bf16.mxu1 %v2261_v10 }
  0x64   :  { %2356 = vmatpush3.bf16.msra.mxu0 %v2591_v18  ;;  %2114 = vmatprep.mubr.f32.mxu0 %v3401_v36  ;;  %v3405_v18 = vld [vmem:[#allocation9_spill] sm:$0xff] }
  0x65   :  { %2358 = vmatprep.subr.bf16.mxu0 %v3402_v13  ;;  %1947 = vmatmul.mubr.f32.gmra.mrb[6].mxu1 %v3403_v49 }
  0x66   :  { %2264 = vmatpush3.bf16.msra.mxu1 %v2261_v10  ;;  %1949 = vmatprep.mubr.f32.mxu1 %v3404_v57 }
  0x67   :  { %2115 = vmatmul.mubr.f32.gmra.mrb[6].mxu0 %v3403_v49  ;;  %2266 = vmatprep.subr.bf16.mxu1 %v2265_v48 }
  0x68   :  { %2360 = vmatpush3.bf16.msra.mxu0 %v3402_v13  ;;  %2117 = vmatprep.mubr.f32.mxu0 %v3404_v57 }
  0x69   :  { %2362 = vmatprep.subr.bf16.mxu0 %v3405_v18  ;;  %1950 = vmatmul.mubr.f32.gmra.mrb[8].mxu1 %v2840_v43 }
  0x6a   :  { %2268 = vmatpush3.bf16.msra.mxu1 %v2265_v48  ;;  %1952 = vmatprep.mubr.f32.mxu1 %v2847_v53 }
  0x6b   :  { %2118 = vmatmul.mubr.f32.gmra.mrb[8].mxu0 %v2840_v43  ;;  %2270 = vmatprep.subr.bf16.mxu1 %v2269_v5 }
  0x6c   :  { %2364 = vmatpush3.bf16.msra.mxu0 %v3405_v18  ;;  %2120 = vmatprep.mubr.f32.mxu0 %v2847_v53  ;;  %v3190_v18 = vld [vmem:[%s3299_s3] ss:$0 sm:$0xff] }
  0x6d   :  { %2366 = vmatprep.subr.bf16.mxu0 %v3406_v6  ;;  %1953 = vmatmul.mubr.f32.gmra.mrb[10].mxu1 %v2886_v0 }
  0x6e   :  { %2272 = vmatpush3.bf16.msra.mxu1 %v2269_v5  ;;  %1955 = vmatprep.mubr.f32.mxu1 %v2905_v54 }
  0x6f   :  { %2121 = vmatmul.mubr.f32.gmra.mrb[10].mxu0 %v2886_v0  ;;  %2274 = vmatprep.subr.bf16.mxu1 %v2273_v11 }
  0x70   :  { %2368 = vmatpush3.bf16.msra.mxu0 %v3406_v6  ;;  %2123 = vmatprep.mubr.f32.mxu0 %v2905_v54 }
  0x71   :  { %2370 = vmatprep.subr.bf16.mxu0 %v3407_v14  ;;  %1956 = vmatmul.mubr.f32.gmra.mrb[12].mxu1 %v3408_v15 }
  0x72   :  { %2276 = vmatpush3.bf16.msra.mxu1 %v2273_v11  ;;  %1958 = vmatprep.mubr.f32.mxu1 %v3409_v50 }
  0x73   :  { %2124 = vmatmul.mubr.f32.gmra.mrb[12].mxu0 %v3408_v15  ;;  %2278 = vmatprep.subr.bf16.mxu1 %v2277_v56 }
  0x74   :  { %2372 = vmatpush3.bf16.msra.mxu0 %v3407_v14  ;;  %2126 = vmatprep.mubr.f32.mxu0 %v3409_v50 }
  0x75   :  { %2374 = vmatprep.subr.bf16.mxu0 %v3410_v9  ;;  %1959 = vmatmul.mubr.f32.gmra.mrb[14].mxu1 %v2974_v45 }
  0x76   :  { %2280 = vmatpush3.bf16.msra.mxu1 %v2277_v56  ;;  %1993 = vmatprep.mubr.f32.mxu1 %v3411_v55 }
  0x77   :  { %2127 = vmatmul.mubr.f32.gmra.mrb[14].mxu0 %v2974_v45  ;;  %1388 = vperm.xlu0 %2462, %v1370_v32  }
  0x78   :  { %2376 = vmatpush3.bf16.msra.mxu0 %v3410_v9  ;;  %2161 = vmatprep.mubr.f32.mxu0 %v2583_v17  ;;  %v1373_v17 = vld [vmem:[%s3298_s2 + $0x18] sm:$0xff] }
  0x79   :  { %1994 = vmatmul.mubr.f32.vlgmr.msra.gmra.mrb[0].mxu1 %v3412_v27  ;;  %1397 = vperm.xlu1 %2463, %v1373_v17  }
  0x7a   :  { %1996 = vmatprep.mubr.f32.mxu1 %v3413_v29 }
  0x7b   :  { %2162 = vmatmul.mubr.f32.vlgmr.msra.gmra.mrb[0].mxu0 %v2608_v26  ;;  %1391 = vperm.xlu0 %2462, %v1371_v16   ;;  %v1375_v26 = vld [vmem:[%s3298_s2 + $0x28] sm:$0xff] }
  0x7c   :  { %2164 = vmatprep.mubr.f32.mxu0 %v2645_v42  ;;  %v1374_v42 = vld [vmem:[%s3298_s2 + $0x20] sm:$0xff] }
  0x7d   :  { %1997 = vmatmul.mubr.f32.gmra.mrb[2].mxu1 %v3414_v34  ;;  %1403 = vperm.xlu1 %2463, %v1375_v26  }
  0x7e   :  { %1999 = vmatprep.mubr.f32.mxu1 %v3415_v58 }
  0x7f   :  { %2165 = vmatmul.mubr.f32.gmra.mrb[2].mxu0 %v2660_v47  ;;  %1400 = vperm.xlu0 %2462, %v1374_v42   ;;  %v1377_v47 = vld [vmem:[%s3298_s2 + $0x38] sm:$0xff] }
  0x80   :  { %2167 = vmatprep.mubr.f32.mxu0 %v2696_v63  ;;  %v1376_v63 = vld [vmem:[%s3298_s2 + $0x30] sm:$0xff] }
  0x81   :  { %2000 = vmatmul.mubr.f32.gmra.mrb[4].mxu1 %v3416_v19  ;;  %1409 = vperm.xlu1 %2463, %v1377_v47  }
  0x82   :  { %2002 = vmatprep.mubr.f32.mxu1 %v3417_v21 }
  0x83   :  { %2168 = vmatmul.mubr.f32.gmra.mrb[4].mxu0 %v2699_v1  ;;  %1406 = vperm.xlu0 %2462, %v1376_v63   ;;  %v1379_v1 = vld [vmem:[%s3298_s2 + $0x48] sm:$0xff] }
  0x84   :  { %2170 = vmatprep.mubr.f32.mxu0 %v3401_v36 }
  0x85   :  { %2003 = vmatmul.mubr.f32.gmra.mrb[6].mxu1 %v3418_v38  ;;  %1415 = vperm.xlu1 %2463, %v1379_v1  }
  0x86   :  { %2005 = vmatprep.mubr.f32.mxu1 %v2838_v22  ;;  %v1381_v22 = vld [vmem:[%s3298_s2 + $0x58] sm:$0xff] }
  0x87   :  { %2171 = vmatmul.mubr.f32.gmra.mrb[6].mxu0 %v3403_v49  ;;  %1412 = vperm.xlu0 %2462, %v1378_v39  }
  0x88   :  { %2173 = vmatprep.mubr.f32.mxu0 %v3404_v57 }
  0x89   :  { %2006 = vmatmul.mubr.f32.gmra.mrb[8].mxu1 %v2884_v40  ;;  %v3420_v40 = vld [vmem:[#allocation24_spill] sm:$0xff]  ;;  %1421 = vperm.xlu1 %2463, %v1381_v22  }
  0x8a   :  { %2008 = vmatprep.mubr.f32.mxu1 %v2896_v60  ;;  %v3421_v60 = vld [vmem:[#allocation26_spill] sm:$0xff] }
  0x8b   :  { %2174 = vmatmul.mubr.f32.gmra.mrb[8].mxu0 %v2840_v43  ;;  %1418 = vperm.xlu0 %2462, %v1380_v33   ;;  %v1383_v43 = vld [vmem:[%s3298_s2 + $0x68] sm:$0xff] }
  0x8c   :  { %2176 = vmatprep.mubr.f32.mxu0 %v2847_v53  ;;  %v1382_v53 = vld [vmem:[%s3298_s2 + $0x60] sm:$0xff] }
  0x8d   :  { %2009 = vmatmul.mubr.f32.gmra.mrb[10].mxu1 %v3419_v46  ;;  %1427 = vperm.xlu1 %2463, %v1383_v43  }
  0x8e   :  { %2011 = vmatprep.mubr.f32.mxu1 %v3420_v40 }
  0x8f   :  { %2177 = vmatmul.mubr.f32.gmra.mrb[10].mxu0 %v2886_v0  ;;  %1424 = vperm.xlu0 %2462, %v1382_v53   ;;  %v1385_v0 = vld [vmem:[%s3298_s2 + $0x78] sm:$0xff] }
  0x90   :  { %2179 = vmatprep.mubr.f32.mxu0 %v2905_v54  ;;  %v1384_v54 = vld [vmem:[%s3298_s2 + $0x70] sm:$0xff] }
  0x91   :  { %2012 = vmatmul.mubr.f32.gmra.mrb[12].mxu1 %v3421_v60  ;;  %1433 = vperm.xlu1 %2463, %v1385_v0  }
  0x92   :  { %2014 = vmatprep.mubr.f32.mxu1 %v2991_v51  ;;  %v2524_v51 = vmov 0.0  }
  0x93   :  { %2180 = vmatmul.mubr.f32.gmra.mrb[12].mxu0 %v3408_v15  ;;  %1430 = vperm.xlu0 %2462, %v1384_v54   ;;  %37 = vst.msk [vmem:[#allocation2 + $0x8] sm:$0xff] %vm35_vm0, %v2524_v51  ;;  %36 = vst.msk [vmem:[#allocation2] sm:$0xff] %vm35_vm0, %v2524_v51 }
  0x94   :  { %2182 = vmatprep.mubr.f32.mxu0 %v3409_v50  ;;  %38 = vst.msk [vmem:[#allocation2 + $0x10] sm:$0xff] %vm35_vm0, %v2524_v51  ;;  %39 = vst.msk [vmem:[#allocation2 + $0x18] sm:$0xff] %vm35_vm0, %v2524_v51 }
  0x95   :  { %2015 = vmatmul.mubr.f32.gmra.mrb[14].mxu1 %v3001_v59  ;;  %40 = vst.msk [vmem:[#allocation2 + $0x20] sm:$0xff] %vm35_vm0, %v2524_v51  ;;  %41 = vst.msk [vmem:[#allocation2 + $0x28] sm:$0xff] %vm35_vm0, %v2524_v51 }
  0x96   :  { %42 = vst.msk [vmem:[#allocation2 + $0x30] sm:$0xff] %vm35_vm0, %v2524_v51  ;;  %43 = vst.msk [vmem:[#allocation2 + $0x38] sm:$0xff] %vm35_vm0, %v2524_v51 }
  0x97   :  { %2183 = vmatmul.mubr.f32.gmra.mrb[14].mxu0 %v2974_v45  ;;  %44 = vst.msk [vmem:[#allocation2 + $0x40] sm:$0xff] %vm35_vm0, %v2524_v51  ;;  %45 = vst.msk [vmem:[#allocation2 + $0x48] sm:$0xff] %vm35_vm0, %v2524_v51 }
  0x98   :  { %46 = vst.msk [vmem:[#allocation2 + $0x50] sm:$0xff] %vm35_vm0, %v2524_v51  ;;  %47 = vst.msk [vmem:[#allocation2 + $0x58] sm:$0xff] %vm35_vm0, %v2524_v51 }
  0x99   :  { %48 = vst.msk [vmem:[#allocation2 + $0x60] sm:$0xff] %vm35_vm0, %v2524_v51  ;;  %49 = vst.msk [vmem:[#allocation2 + $0x68] sm:$0xff] %vm35_vm0, %v2524_v51 }
  0x9a   :  { %50 = vst.msk [vmem:[#allocation2 + $0x70] sm:$0xff] %vm35_vm0, %v2524_v51  ;;  %51 = vst.msk [vmem:[#allocation2 + $0x78] sm:$0xff] %vm35_vm0, %v2524_v51 }
  0xda   :  { %v3183_v59 = vpop.permute.xlu1 %1394 }
  0xdb   :  { %vm1441_vm4 = vcmp.ne.s32.totalorder %v3183_v59, %v3190_v18 }
  0xf6   :  { %v1389_v45 = vpop.permute.xlu0 %1388 }
  0xf7   :  { %vm1439_vm2 = vcmp.ne.s32.totalorder %v1389_v45, %v3190_v18 }
  0xf8   :  { %v1398_v31 = vpop.permute.xlu1 %1397 }
  0xf9   :  { %vm1442_vm3 = vcmp.ne.s32.totalorder %v1398_v31, %v3190_v18 }
  0xfa   :  { %v1392_v44 = vpop.permute.xlu0 %1391 }
  0xfb   :  { %vm1440_vm1 = vcmp.ne.s32.totalorder %v1392_v44, %v3190_v18 }
  0xfc   :  { %v3192_v6 = vpop.permute.xlu1 %1403 }
  0xfd   :  { %vm1444_vm6 = vcmp.ne.s32.totalorder %v3192_v6, %v3190_v18 }
  0xfe   :  { %v3185_v4 = vpop.permute.xlu0 %1400 }
  0xff   :  { %vm1443_vm5 = vcmp.ne.s32.totalorder %v3185_v4, %v3190_v18 }
 0x100   :  { %v1410_v38 = vpop.permute.xlu1 %1409 }
 0x101   :  { %vm1446_vm8 = vcmp.ne.s32.totalorder %v1410_v38, %v3190_v18  ;;  %v1487_v38 = vld [vmem:[#allocation2] sm:$0xff] }
 0x102   :  { %v3194_v11 = vpop.permute.xlu0 %1406 }
 0x103   :  { %vm1445_vm7 = vcmp.ne.s32.totalorder %v3194_v11, %v3190_v18 }
 0x104   :  { %v1416_v59 = vpop.permute.xlu1 %1415 }
 0x105   :  { %vm1448_vm10 = vcmp.ne.s32.totalorder %v1416_v59, %v3190_v18  ;;  %v1494_v59 = vld [vmem:[#allocation2 + $0x38] sm:$0xff] }
 0x106   :  { %v1413_v1 = vpop.permute.xlu0 %1412 }
 0x107   :  { %vm1447_vm9 = vcmp.ne.s32.totalorder %v1413_v1, %v3190_v18 }
 0x108   :  { %v1422_v11 = vpop.permute.xlu1 %1421 }
 0x109   :  { %vm1450_vm12 = vcmp.ne.s32.totalorder %v1422_v11, %v3190_v18  ;;  %v1498_v11 = vld [vmem:[#allocation2 + $0x58] sm:$0xff] }
 0x10a   :  { %v1419_v4 = vpop.permute.xlu0 %1418 }
 0x10b   :  { %vm1449_vm11 = vcmp.ne.s32.totalorder %v1419_v4, %v3190_v18  ;;  %v1495_v4 = vld [vmem:[#allocation2 + $0x40] sm:$0xff] }
 0x14c   :  { %v1995_v8 = vpop.f32.mrb[0].mxu1 }
 0x14d   :  { %v666_v37 = vpop.f32.mrb[1].mxu1 }
 0x14e   :  { %v2163_v52 = vpop.f32.mrb[0].mxu0 }
 0x14f   :  { %v2377_v41 = vadd.f32 %v2163_v52, %v1995_v8  ;;  %v1276_v7 = vpop.f32.mrb[1].mxu0 }
 0x150   :  { %v2378_v28 = vadd.f32 %v1276_v7, %v666_v37  ;;  %v1998_v62 = vpop.f32.mrb[2].mxu1 }
 0x151   :  { %v1457_v3 = vmul.f32 1.442695, %v2377_v41  ;;  %v680_v2 = vpop.f32.mrb[3].mxu1 }
 0x152   :  { %v1455_v30 = vmul.f32 1.442695, %v2378_v28  ;;  %v2166_v12 = vpop.f32.mrb[2].mxu0 }
 0x153   :  { %2464 = vpow2.f32 %v1457_v3  ;;  %v2379_v24 = vadd.f32 %v2166_v12, %v1998_v62  ;;  %v1288_v25 = vpop.f32.mrb[3].mxu0 }
 0x154   :  { %2466 = vpow2.f32 %v1455_v30  ;;  %v2380_v61 = vadd.f32 %v1288_v25, %v680_v2  ;;  %v2001_v36 = vpop.f32.mrb[4].mxu1 }
 0x155   :  { %v1461_v35 = vmul.f32 1.442695, %v2379_v24  ;;  %v694_v49 = vpop.f32.mrb[5].mxu1 }
 0x156   :  { %v1459_v10 = vmul.f32 1.442695, %v2380_v61  ;;  %v2169_v13 = vpop.f32.mrb[4].mxu0 }
 0x157   :  { %2468 = vpow2.f32 %v1461_v35  ;;  %v2381_v48 = vadd.f32 %v2169_v13, %v2001_v36  ;;  %v1300_v57 = vpop.f32.mrb[5].mxu0 }
 0x158   :  { %v2382_v5 = vadd.f32 %v1300_v57, %v694_v49  ;;  %2470 = vpow2.f32 %v1459_v10  ;;  %v2004_v15 = vpop.f32.mrb[6].mxu1 }
 0x159   :  { %v1465_v14 = vmul.f32 1.442695, %v2381_v48  ;;  %v708_v55 = vpop.f32.mrb[7].mxu1 }
 0x15a   :  { %v1463_v56 = vmul.f32 1.442695, %v2382_v5  ;;  %v2172_v50 = vpop.f32.mrb[6].mxu0 }
 0x15b   :  { %v2383_v9 = vadd.f32 %v2172_v50, %v2004_v15  ;;  %v1312_v23 = vpop.f32.mrb[7].mxu0  ;;  %v1425_v50 = vpop.permute.xlu0 %1424 }
 0x15c   :  { %2472 = vpow2.f32 %v1463_v56  ;;  %v2384_v20 = vadd.f32 %v1312_v23, %v708_v55  ;;  %v2007_v16 = vpop.f32.mrb[8].mxu1  ;;  %vm1451_vm13 = vcmp.ne.s32.totalorder %v1425_v50, %v3190_v18 }
 0x15d   :  { %v2465_v32 = vpop.eup %2464  ;;  %v1469_v27 = vmul.f32 1.442695, %v2383_v9  ;;  %2474 = vpow2.f32 %v1465_v14  ;;  %v722_v19 = vpop.f32.mrb[9].mxu1 }
 0x15e   :  { %v2467_v29 = vpop.eup %2466  ;;  %v1467_v17 = vmul.f32 1.442695, %v2384_v20  ;;  %v2175_v34 = vpop.f32.mrb[8].mxu0  ;;  %v1504_v58 = vsel %vm1440_vm1, %v2465_v32, 0.0 }
 0x15f   :  { %v2385_v26 = vadd.f32 %v2175_v34, %v2007_v16  ;;  %v1324_v42 = vpop.f32.mrb[9].mxu0  ;;  %1521 = vadd.xlane.f32.xlu1 %v1504_v58  ;;  %v1503_v21 = vsel %vm1439_vm2, %v2467_v29, 0.0  ;;  %v1428_v32 = vpop.permute.xlu1 %1427 }
 0x160   :  { %2476 = vpow2.f32 %v1467_v17  ;;  %v2386_v47 = vadd.f32 %v1324_v42, %v722_v19  ;;  %1519 = vadd.xlane.f32.xlu0 %v1503_v21  ;;  %v2010_v33 = vpop.f32.mrb[10].mxu1  ;;  %v1431_v29 = vpop.permute.xlu0 %1430  ;;  %vm1452_vm14 = vcmp.ne.s32.totalorder %v1428_v32, %v3190_v18 }
 0x161   :  { %v2469_v63 = vpop.eup %2468  ;;  %v1473_v39 = vmul.f32 1.442695, %v2385_v26  ;;  %2478 = vpow2.f32 %v1469_v27  ;;  %v736_v53 = vpop.f32.mrb[11].mxu1  ;;  %vm1453_vm15 = vcmp.ne.s32.totalorder %v1431_v29, %v3190_v18 }
 0x162   :  { %v1471_v22 = vmul.f32 1.442695, %v2386_v47  ;;  %v2178_v46 = vpop.f32.mrb[10].mxu0  ;;  %v1506_v40 = vsel %vm1442_vm3, %v2469_v63, 0.0  ;;  %v2471_v0 = vpop.eup %2470  ;;  %v1488_v63 = vld [vmem:[#allocation2 + $0x8] sm:$0xff] }
 0x163   :  { %v2387_v43 = vadd.f32 %v2178_v46, %v2010_v33  ;;  %v1336_v60 = vpop.f32.mrb[11].mxu0  ;;  %v1505_v28 = vsel %vm1441_vm4, %v2471_v0, 0.0  ;;  %v1434_v26 = vpop.permute.xlu1 %1433  ;;  %v1490_v46 = vld [vmem:[#allocation2 + $0x18] sm:$0xff] }
 0x164   :  { %2480 = vpow2.f32 %v1471_v22  ;;  %v2388_v54 = vadd.f32 %v1336_v60, %v736_v53  ;;  %1525 = vadd.xlane.f32.xlu0 %v1506_v40  ;;  %v2013_v8 = vpop.f32.mrb[12].mxu1  ;;  %vm1454_vm1 = vcmp.ne.s32.totalorder %v1434_v26, %v3190_v18  ;;  %v1489_v53 = vld [vmem:[#allocation2 + $0x10] sm:$0xff]  ;;  %v1491_v60 = vld [vmem:[#allocation2 + $0x20] sm:$0xff] }
 0x165   :  { %2482 = vpow2.f32 %v1473_v39  ;;  %v1477_v45 = vmul.f32 1.442695, %v2387_v43  ;;  %v750_v37 = vpop.f32.mrb[13].mxu1 }
 0x166   :  { %v2473_v51 = vpop.eup %2472  ;;  %v1475_v44 = vmul.f32 1.442695, %v2388_v54  ;;  %v2181_v52 = vpop.f32.mrb[12].mxu0 }
 0x167   :  { %v2389_v41 = vadd.f32 %v2181_v52, %v2013_v8  ;;  %v1348_v7 = vpop.f32.mrb[13].mxu0  ;;  %v1507_v31 = vsel %vm1443_vm5, %v2473_v51, 0.0  ;;  %v2475_v3 = vpop.eup %2474  ;;  %v1492_v52 = vld [vmem:[#allocation2 + $0x28] sm:$0xff] }
 0x168   :  { %2484 = vpow2.f32 %v1475_v44  ;;  %v2390_v30 = vadd.f32 %v1348_v7, %v750_v37  ;;  %1523 = vadd.xlane.f32.xlu0 %v1505_v28  ;;  %1527 = vadd.xlane.f32.xlu1 %v1507_v31  ;;  %v2016_v2 = vpop.f32.mrb[14].mxu1  ;;  %v1508_v36 = vsel %vm1444_vm6, %v2475_v3, 0.0 }
 0x169   :  { %2486 = vpow2.f32 %v1477_v45  ;;  %v1481_v12 = vmul.f32 1.442695, %v2389_v41  ;;  %v764_v35 = vpop.f32.mrb[15].mxu1  ;;  %v1493_v41 = vld [vmem:[#allocation2 + $0x30] sm:$0xff] }
 0x16a   :  { %v2477_v62 = vpop.eup %2476  ;;  %v1479_v24 = vmul.f32 1.442695, %v2390_v30  ;;  %v2184_v25 = vpop.f32.mrb[14].mxu0 }
 0x16b   :  { %v2391_v61 = vadd.f32 %v2184_v25, %v2016_v2  ;;  %v1360_v10 = vpop.f32.mrb[15].mxu0  ;;  %v1509_v13 = vsel %vm1445_vm7, %v2477_v62, 0.0  ;;  %v2479_v48 = vpop.eup %2478 }
 0x16c   :  { %2488 = vpow2.f32 %v1479_v24  ;;  %v2392_v49 = vadd.f32 %v1360_v10, %v764_v35  ;;  %1529 = vadd.xlane.f32.xlu0 %v1508_v36  ;;  %1531 = vadd.xlane.f32.xlu1 %v1509_v13  ;;  %v1510_v14 = vsel %vm1446_vm8, %v2479_v48, 0.0  ;;  %v1497_v36 = vld [vmem:[#allocation2 + $0x50] sm:$0xff] }
 0x16d   :  { %2490 = vpow2.f32 %v1481_v12  ;;  %v1485_v5 = vmul.f32 1.442695, %v2391_v61  ;;  %v1496_v61 = vld [vmem:[#allocation2 + $0x48] sm:$0xff] }
 0x16e   :  { %v2481_v57 = vpop.eup %2480  ;;  %v1483_v6 = vmul.f32 1.442695, %v2392_v49 }
 0x16f   :  { %v1511_v56 = vsel %vm1447_vm9, %v2481_v57, 0.0  ;;  %v2483_v15 = vpop.eup %2482 }
 0x170   :  { %2492 = vpow2.f32 %v1483_v6  ;;  %1533 = vadd.xlane.f32.xlu0 %v1510_v14  ;;  %1535 = vadd.xlane.f32.xlu1 %v1511_v56  ;;  %v1512_v55 = vsel %vm1448_vm10, %v2483_v15, 0.0  ;;  %v1499_v15 = vld [vmem:[#allocation2 + $0x60] sm:$0xff] }
 0x171   :  { %2494 = vpow2.f32 %v1485_v5 }
 0x172   :  { %v2485_v9 = vpop.eup %2484 }
 0x173   :  { %v1513_v23 = vsel %vm1449_vm11, %v2485_v9, 0.0  ;;  %v2487_v20 = vpop.eup %2486 }
 0x174   :  { %1537 = vadd.xlane.f32.xlu0 %v1512_v55  ;;  %1539 = vadd.xlane.f32.xlu1 %v1513_v23  ;;  %v1514_v17 = vsel %vm1450_vm12, %v2487_v20, 0.0 }
 0x176   :  { %v2489_v27 = vpop.eup %2488 }
 0x177   :  { %v1515_v16 = vsel %vm1451_vm13, %v2489_v27, 0.0  ;;  %v2491_v34 = vpop.eup %2490  ;;  %v1500_v27 = vld [vmem:[#allocation2 + $0x68] sm:$0xff] }
 0x178   :  { %1541 = vadd.xlane.f32.xlu0 %v1514_v17  ;;  %1543 = vadd.xlane.f32.xlu1 %v1515_v16  ;;  %v1516_v42 = vsel %vm1452_vm14, %v2491_v34, 0.0  ;;  %v1501_v16 = vld [vmem:[#allocation2 + $0x70] sm:$0xff] }
 0x17a   :  { %v2493_v58 = vpop.eup %2492 }
 0x17b   :  { %v1517_v19 = vsel %vm1453_vm15, %v2493_v58, 0.0  ;;  %v2495_v21 = vpop.eup %2494 }
 0x17c   :  { %1545 = vadd.xlane.f32.xlu0 %v1516_v42  ;;  %1547 = vadd.xlane.f32.xlu1 %v1517_v19  ;;  %v1518_v47 = vsel %vm1454_vm1, %v2495_v21, 0.0 }
 0x180   :  { %1549 = vadd.xlane.f32.xlu0 %v1518_v47 }
 0x1ec   :  { %v1522_v1 = vpop.xlane.xlu1 %1521 }
 0x1ed   :  { %v1552_v39 = vadd.f32 %v1522_v1, %v1488_v63  ;;  %v1520_v22 = vpop.xlane.xlu0 %1519 }
 0x1ee   :  { %v1551_v33 = vadd.f32 %v1520_v22, %v1487_v38  ;;  %v1502_v38 = vld [vmem:[#allocation2 + $0x78] sm:$0xff] }
 0x1ef   :  { %1569 = vst.msk [vmem:[#allocation2 + $0x8] sm:$0xff] %vm35_vm0, %v1552_v39 }
 0x1f0   :  { %1568 = vst.msk [vmem:[#allocation2] sm:$0xff] %vm35_vm0, %v1551_v33 }
 0x1f1   :  { %v1526_v40 = vpop.xlane.xlu0 %1525 }
 0x1f2   :  { %v1554_v43 = vadd.f32 %v1526_v40, %v1490_v46 }
 0x1f4   :  { %1571 = vst.msk [vmem:[#allocation2 + $0x18] sm:$0xff] %vm35_vm0, %v1554_v43 }
 0x1f5   :  { %v1524_v18 = vpop.xlane.xlu0 %1523  ;;  %v1528_v0 = vpop.xlane.xlu1 %1527 }
 0x1f6   :  { %v1588_v54 = vld [vmem:[#allocation2 + $0x8] sm:$0xff]  ;;  %v1553_v51 = vadd.f32 %v1524_v18, %v1489_v53  ;;  %v1555_v45 = vadd.f32 %v1528_v0, %v1491_v60 }
 0x1f7   :  { %v1642_v44 = vadd.f32 -120.0, %v1588_v54  ;;  %v1587_v8 = vld [vmem:[#allocation2] sm:$0xff] }
 0x1f8   :  { %v1641_v37 = vadd.f32 -120.0, %v1587_v8  ;;  %1570 = vst.msk [vmem:[#allocation2 + $0x10] sm:$0xff] %vm35_vm0, %v1553_v51  ;;  %1572 = vst.msk [vmem:[#allocation2 + $0x20] sm:$0xff] %vm35_vm0, %v1555_v45 }
 0x1f9   :  { %1620 = vst.msk [vmem:[%s3300_s4 + $0x8] sm:$0xff] %vm35_vm0, %v1642_v44  ;;  %v1530_v7 = vpop.xlane.xlu0 %1529  ;;  %v1532_v28 = vpop.xlane.xlu1 %1531 }
 0x1fa   :  { %1619 = vst.msk [vmem:[%s3300_s4] sm:$0xff] %vm35_vm0, %v1641_v37  ;;  %v1556_v31 = vadd.f32 %v1530_v7, %v1492_v52  ;;  %v1557_v3 = vadd.f32 %v1532_v28, %v1493_v41 }
 0x1fb   :  { %v1590_v30 = vld [vmem:[#allocation2 + $0x18] sm:$0xff] }
 0x1fc   :  { %v1644_v62 = vadd.f32 -120.0, %v1590_v30  ;;  %1573 = vst.msk [vmem:[#allocation2 + $0x28] sm:$0xff] %vm35_vm0, %v1556_v31  ;;  %1574 = vst.msk [vmem:[#allocation2 + $0x30] sm:$0xff] %vm35_vm0, %v1557_v3 }
 0x1fd   :  { %v1534_v12 = vpop.xlane.xlu0 %1533  ;;  %v1536_v24 = vpop.xlane.xlu1 %1535 }
 0x1fe   :  { %1622 = vst.msk [vmem:[%s3300_s4 + $0x18] sm:$0xff] %vm35_vm0, %v1644_v62  ;;  %v1558_v2 = vadd.f32 %v1534_v12, %v1494_v59  ;;  %v1559_v25 = vadd.f32 %v1536_v24, %v1495_v4 }
 0x1ff   :  { %v1589_v35 = vld [vmem:[#allocation2 + $0x10] sm:$0xff]  ;;  %v1591_v10 = vld [vmem:[#allocation2 + $0x20] sm:$0xff] }
 0x200   :  { %v1643_v13 = vadd.f32 -120.0, %v1589_v35  ;;  %v1645_v48 = vadd.f32 -120.0, %v1591_v10  ;;  %1575 = vst.msk [vmem:[#allocation2 + $0x38] sm:$0xff] %vm35_vm0, %v1558_v2  ;;  %1576 = vst.msk [vmem:[#allocation2 + $0x40] sm:$0xff] %vm35_vm0, %v1559_v25 }
 0x201   :  { %v1538_v49 = vpop.xlane.xlu0 %1537  ;;  %v1540_v57 = vpop.xlane.xlu1 %1539 }
 0x202   :  { %1621 = vst.msk [vmem:[%s3300_s4 + $0x10] sm:$0xff] %vm35_vm0, %v1643_v13  ;;  %1623 = vst.msk [vmem:[%s3300_s4 + $0x20] sm:$0xff] %vm35_vm0, %v1645_v48  ;;  %v1560_v5 = vadd.f32 %v1538_v49, %v1496_v61  ;;  %v1561_v6 = vadd.f32 %v1540_v57, %v1497_v36 }
 0x203   :  { %v1592_v14 = vld [vmem:[#allocation2 + $0x28] sm:$0xff]  ;;  %v1593_v56 = vld [vmem:[#allocation2 + $0x30] sm:$0xff] }
 0x204   :  { %v1646_v50 = vadd.f32 -120.0, %v1592_v14  ;;  %v1647_v9 = vadd.f32 -120.0, %v1593_v56  ;;  %1577 = vst.msk [vmem:[#allocation2 + $0x48] sm:$0xff] %vm35_vm0, %v1560_v5  ;;  %1578 = vst.msk [vmem:[#allocation2 + $0x50] sm:$0xff] %vm35_vm0, %v1561_v6 }
 0x205   :  { %v1542_v55 = vpop.xlane.xlu0 %1541  ;;  %v1544_v23 = vpop.xlane.xlu1 %1543 }
 0x206   :  { %1624 = vst.msk [vmem:[%s3300_s4 + $0x28] sm:$0xff] %vm35_vm0, %v1646_v50  ;;  %1625 = vst.msk [vmem:[%s3300_s4 + $0x30] sm:$0xff] %vm35_vm0, %v1647_v9  ;;  %v1562_v20 = vadd.f32 %v1542_v55, %v1498_v11  ;;  %v1563_v32 = vadd.f32 %v1544_v23, %v1499_v15 }
 0x207   :  { %v1594_v29 = vld [vmem:[#allocation2 + $0x38] sm:$0xff]  ;;  %v1595_v17 = vld [vmem:[#allocation2 + $0x40] sm:$0xff] }
 0x208   :  { %v1648_v34 = vadd.f32 -120.0, %v1594_v29  ;;  %v1649_v58 = vadd.f32 -120.0, %v1595_v17  ;;  %1579 = vst.msk [vmem:[#allocation2 + $0x58] sm:$0xff] %vm35_vm0, %v1562_v20  ;;  %1580 = vst.msk [vmem:[#allocation2 + $0x60] sm:$0xff] %vm35_vm0, %v1563_v32 }
 0x209   :  { %v1546_v26 = vpop.xlane.xlu0 %1545  ;;  %v1548_v42 = vpop.xlane.xlu1 %1547 }
 0x20a   :  { %1626 = vst.msk [vmem:[%s3300_s4 + $0x38] sm:$0xff] %vm35_vm0, %v1648_v34  ;;  %1627 = vst.msk [vmem:[%s3300_s4 + $0x40] sm:$0xff] %vm35_vm0, %v1649_v58  ;;  %v1564_v19 = vadd.f32 %v1546_v26, %v1500_v27  ;;  %v1565_v21 = vadd.f32 %v1548_v42, %v1501_v16 }
 0x20b   :  { %v1596_v47 = vld [vmem:[#allocation2 + $0x48] sm:$0xff]  ;;  %v1597_v63 = vld [vmem:[#allocation2 + $0x50] sm:$0xff] }
 0x20c   :  { %v1650_v1 = vadd.f32 -120.0, %v1596_v47  ;;  %v1651_v39 = vadd.f32 -120.0, %v1597_v63  ;;  %1581 = vst.msk [vmem:[#allocation2 + $0x68] sm:$0xff] %vm35_vm0, %v1564_v19  ;;  %1582 = vst.msk [vmem:[#allocation2 + $0x70] sm:$0xff] %vm35_vm0, %v1565_v21 }
 0x20d   :  { %v1550_v22 = vpop.xlane.xlu0 %1549 }
 0x20e   :  { %1628 = vst.msk [vmem:[%s3300_s4 + $0x48] sm:$0xff] %vm35_vm0, %v1650_v1  ;;  %1629 = vst.msk [vmem:[%s3300_s4 + $0x50] sm:$0xff] %vm35_vm0, %v1651_v39  ;;  %v1566_v33 = vadd.f32 %v1550_v22, %v1502_v38 }
 0x20f   :  { %v1598_v46 = vld [vmem:[#allocation2 + $0x58] sm:$0xff]  ;;  %v1599_v40 = vld [vmem:[#allocation2 + $0x60] sm:$0xff] }
 0x210   :  { %v1652_v43 = vadd.f32 -120.0, %v1598_v46  ;;  %v1653_v53 = vadd.f32 -120.0, %v1599_v40  ;;  %1583 = vst.msk [vmem:[#allocation2 + $0x78] sm:$0xff] %vm35_vm0, %v1566_v33 }
 0x212   :  { %1630 = vst.msk [vmem:[%s3300_s4 + $0x58] sm:$0xff] %vm35_vm0, %v1652_v43  ;;  %1631 = vst.msk [vmem:[%s3300_s4 + $0x60] sm:$0xff] %vm35_vm0, %v1653_v53 }
 0x213   :  { %v1600_v60 = vld [vmem:[#allocation2 + $0x68] sm:$0xff]  ;;  %v1601_v18 = vld [vmem:[#allocation2 + $0x70] sm:$0xff] }
 0x214   :  { %v1654_v0 = vadd.f32 -120.0, %v1600_v60  ;;  %v1655_v54 = vadd.f32 -120.0, %v1601_v18 }
 0x216   :  { %1632 = vst.msk [vmem:[%s3300_s4 + $0x68] sm:$0xff] %vm35_vm0, %v1654_v0  ;;  %1633 = vst.msk [vmem:[%s3300_s4 + $0x70] sm:$0xff] %vm35_vm0, %v1655_v54 }
 0x217   :  { %v1602_v51 = vld [vmem:[#allocation2 + $0x78] sm:$0xff] }
 0x218   :  { %v1656_v45 = vadd.f32 -120.0, %v1602_v51 }
 0x21a   :  { %1634 = vst.msk [vmem:[%s3300_s4 + $0x78] sm:$0xff] %vm35_vm0, %v1656_v45 }
 0x21b   :  { %1639 = vsyncpa [#allocation4], 1 }

</bundles_post_ra>
